<compile_context>
chip_gen: v7x
topology: tpu7x:2x2x1
jax: 0.10.0
libtpu: 0.0.40
codegen_flags: <defaults>
</compile_context>

<pallas_src>
import functools
import math

import jax
import jax.numpy as jnp
from jax.experimental import pallas as pl
from jax.experimental.pallas import tpu as pltpu


# One output block ~2 MiB -> ~4 MiB double-buffered: safe on v5e/v6e/v7x scoped VMEM.
_TARGET_BLOCK_BYTES = 2 << 20
# Fuse several tensors into one launch only while the extra concat/split copies
# stay cheap; past this the saved launch overhead no longer pays for the copies.
_FUSE_BYTES_LIMIT = 64 << 20

# Tri-state: None = not yet tried, True/False = crop-in-DMA path supported or not.
_CROP_IN_DMA_OK = None


# ---------------------------------------------------------------------------
# Kernels
# ---------------------------------------------------------------------------
def _crop_dma_kernel(x_hbm, o_ref, copy_sem, *, off_h, off_w, ch, cw,
                     block_rows, tail_rows, num_blocks):
    """DMA-only body: copy the crop window of `block_rows` image planes
    straight from HBM into the pipelined output VMEM block."""
    i = pl.program_id(0)
    row0 = i * block_rows

    def copy_rows(rows):
        cp = pltpu.make_async_copy(
            x_hbm.at[pl.ds(row0, rows), pl.ds(off_h, ch), pl.ds(off_w, cw)],
            o_ref.at[pl.ds(0, rows)],
            copy_sem,
        )
        cp.start()
        cp.wait()

    if tail_rows == block_rows:
        # block_rows divides the row count: every grid step is a full block.
        copy_rows(block_rows)
    else:
        @pl.when(i < num_blocks - 1)
        def _():
            copy_rows(block_rows)

        @pl.when(i == num_blocks - 1)
        def _():
            # Manual DMA must stay in bounds; the pipeline clips the writeback
            # of the (undefined) rows past `tail_rows`.
            copy_rows(tail_rows)


def _crop_vmem_kernel(x_ref, o_ref, *, off_h, off_w, ch, cw):
    """Fallback body: full-(H, W) rows are pipelined into VMEM, crop is a
    static slice.  Still row-batched, so per-step overhead is amortized."""
    o_ref[...] = x_ref[:, off_h:off_h + ch, off_w:off_w + cw]


# ---------------------------------------------------------------------------
# pallas_call wrappers
# ---------------------------------------------------------------------------
def _crop_rows_pallas(x, *, ch, cw, off_h, off_w, crop_in_dma):
    """Center-crop a (M, H, W) slab of image planes to (M, ch, cw)."""
    M, H, W = x.shape
    itemsize = jnp.dtype(x.dtype).itemsize
    row_bytes = (ch * cw if crop_in_dma else H * W) * itemsize
    block_rows = max(1, min(M, _TARGET_BLOCK_BYTES // max(1, row_bytes)))
    num_blocks = pl.cdiv(M, block_rows)

    if crop_in_dma:
        tail_rows = M - (num_blocks - 1) * block_rows
        kernel = functools.partial(
            _crop_dma_kernel, off_h=off_h, off_w=off_w, ch=ch, cw=cw,
            block_rows=block_rows, tail_rows=tail_rows, num_blocks=num_blocks)
        grid_spec = pltpu.PrefetchScalarGridSpec(
            num_scalar_prefetch=0,
            grid=(num_blocks,),
            in_specs=[pl.BlockSpec(memory_space=pl.ANY)],   # raw HBM, crop via DMA
            out_specs=pl.BlockSpec((block_rows, ch, cw), lambda i: (i, 0, 0)),
            scratch_shapes=[pltpu.SemaphoreType.DMA],
        )
    else:
        kernel = functools.partial(
            _crop_vmem_kernel, off_h=off_h, off_w=off_w, ch=ch, cw=cw)
        grid_spec = pltpu.PrefetchScalarGridSpec(
            num_scalar_prefetch=0,
            grid=(num_blocks,),
            in_specs=[pl.BlockSpec((block_rows, H, W), lambda i: (i, 0, 0))],
            out_specs=pl.BlockSpec((block_rows, ch, cw), lambda i: (i, 0, 0)),
        )

    return pl.pallas_call(
        kernel,
        out_shape=jax.ShapeDtypeStruct((M, ch, cw), x.dtype),
        grid_spec=grid_spec,
        compiler_params=pltpu.CompilerParams(
            dimension_semantics=("parallel",)),
    )(x)


def _crop_rows(x, *, ch, cw, off_h, off_w):
    """Dispatch to the DMA-crop kernel, falling back to the in-VMEM-crop kernel
    once if the unaligned-window DMA fails to lower on this toolchain."""
    global _CROP_IN_DMA_OK
    if _CROP_IN_DMA_OK is not False:
        try:
            out = _crop_rows_pallas(x, ch=ch, cw=cw, off_h=off_h, off_w=off_w,
                                    crop_in_dma=True)
            _CROP_IN_DMA_OK = True
            return out
        except Exception:
            _CROP_IN_DMA_OK = False
    return _crop_rows_pallas(x, ch=ch, cw=cw, off_h=off_h, off_w=off_w,
                             crop_in_dma=False)


# ---------------------------------------------------------------------------
# Public crop helpers
# ---------------------------------------------------------------------------
def _crop_size(size):
    if isinstance(size, (tuple, list)):
        return int(size[0]), int(size[1])
    return int(size), int(size)


def _center_offsets(H, W, ch, cw):
    # torchvision F.center_crop offset convention.
    return int(round((H - ch) / 2.0)), int(round((W - cw) / 2.0))


def center_crop(x, size):
    """Center-crop the trailing (H, W) dims of `x` (e.g. NCHW) to `size`."""
    ch, cw = _crop_size(size)
    H, W = x.shape[-2], x.shape[-1]
    assert ch <= H and cw <= W, "crop larger than image not supported"
    # TODO(synk): torchvision pads when the crop exceeds the image; not implemented.
    off_h, off_w = _center_offsets(H, W, ch, cw)
    lead = x.shape[:-2]
    m = math.prod(lead)  # math.prod(()) == 1
    out = _crop_rows(x.reshape(m, H, W), ch=ch, cw=cw, off_h=off_h, off_w=off_w)
    return out.reshape(lead + (ch, cw))


def _crop_group(xs, *, ch, cw, off_h, off_w):
    """Crop a group of (m_i, H, W) slabs (same H, W, dtype) with ONE launch."""
    stacked = xs[0] if len(xs) == 1 else jnp.concatenate(xs, axis=0)
    cropped = _crop_rows(stacked, ch=ch, cw=cw, off_h=off_h, off_w=off_w)
    pieces, start = [], 0
    for x in xs:
        m = x.shape[0]
        pieces.append(cropped[start:start + m])
        start += m
    return pieces


def _center_crop_many(arrays, ch, cw):
    """Crop a list of arrays; tensors sharing (H, W, dtype) are fused into a
    single pallas_call (concat -> one kernel -> split) while that stays cheap."""
    out = [None] * len(arrays)
    groups = {}
    for idx, x in enumerate(arrays):
        H, W = int(x.shape[-2]), int(x.shape[-1])
        assert ch <= H and cw <= W, "crop larger than image not supported"
        groups.setdefault((H, W, str(x.dtype)), []).append(idx)

    for (H, W, _), idxs in groups.items():
        off_h, off_w = _center_offsets(H, W, ch, cw)
        total_bytes = sum(arrays[i].size * arrays[i].dtype.itemsize for i in idxs)
        if len(idxs) > 1 and total_bytes <= _FUSE_BYTES_LIMIT:
            xs = tuple(arrays[i].reshape(math.prod(arrays[i].shape[:-2]), H, W)
                       for i in idxs)
            pieces = _crop_group(xs, ch=ch, cw=cw, off_h=off_h, off_w=off_w)
            for i, piece in zip(idxs, pieces):
                out[i] = piece.reshape(arrays[i].shape[:-2] + (ch, cw))
        else:
            for i in idxs:
                out[i] = center_crop(arrays[i], (ch, cw))
    return out


class CenterCrop:
    """JAX/Pallas equivalent of the PyTorch CenterCrop module (NCHW layout)."""

    def __init__(self, size):
        self.size = _crop_size(size)

    def __call__(self, pv_imgs, art_imgs, pv_mask=None, art_mask=None):
        ch, cw = self.size
        flat = []

        def add(x):
            flat.append(x)
            return len(flat) - 1

        if isinstance(pv_imgs, list):
            pv_idx = [add(x) for x in pv_imgs]
            art_idx = [add(x) for x in art_imgs]
        else:
            pv_idx = add(pv_imgs)
            art_idx = add(art_imgs)

        have_mask = pv_mask is not None
        if have_mask:
            if isinstance(pv_mask, list):
                pvm_idx = [add(x) for x in pv_mask]
                artm_idx = [add(x) for x in art_mask]
            else:
                pvm_idx = add(pv_mask)
                artm_idx = add(art_mask)

        cropped = _center_crop_many(flat, ch, cw)

        def pick(idx):
            return [cropped[i] for i in idx] if isinstance(idx, list) else cropped[idx]

        pv_out = pick(pv_idx)
        art_out = pick(art_idx)
        pvm_out = pick(pvm_idx) if have_mask else None
        artm_out = pick(artm_idx) if have_mask else None
        return pv_out, art_out, pvm_out, artm_out


if __name__ == "__main__":
    key = jax.random.PRNGKey(0)
    k1, k2, k3, k4 = jax.random.split(key, 4)

    N, C, H, W = 2, 4, 16, 16
    crop_size = 8

    pv_imgs = jax.random.normal(k1, (N, C, H, W), dtype=jnp.float32)
    art_imgs = jax.random.normal(k2, (N, C, H, W), dtype=jnp.float32)
    pv_mask = (jax.random.uniform(k3, (N, 1, H, W)) > 0.5).astype(jnp.float32)
    art_mask = (jax.random.uniform(k4, (N, 1, H, W)) > 0.5).astype(jnp.float32)

    mod = CenterCrop(crop_size)
    out_pv, out_art, out_pvm, out_artm = mod(pv_imgs, art_imgs, pv_mask, art_mask)
    jax.block_until_ready((out_pv, out_art, out_pvm, out_artm))

    # Reference check against plain JAX slicing (same torchvision offset convention).
    off = int(round((H - crop_size) / 2.0))
    ref_pv = pv_imgs[:, :, off:off + crop_size, off:off + crop_size]
    ref_art = art_imgs[:, :, off:off + crop_size, off:off + crop_size]
    ref_pvm = pv_mask[:, :, off:off + crop_size, off:off + crop_size]
    ref_artm = art_mask[:, :, off:off + crop_size, off:off + crop_size]

    assert out_pv.shape == (N, C, crop_size, crop_size)
    assert out_pvm.shape == (N, 1, crop_size, crop_size)
    assert jnp.array_equal(out_pv, ref_pv)
    assert jnp.array_equal(out_art, ref_art)
    assert jnp.array_equal(out_pvm, ref_pvm)
    assert jnp.array_equal(out_artm, ref_artm)

    # Also exercise the list path (no masks).
    pv_list = [pv_imgs, pv_imgs * 2.0]
    art_list = [art_imgs, art_imgs * 2.0]
    lp, la, lm, lam = mod(pv_list, art_list)
    jax.block_until_ready((lp, la))
    assert lm is None and lam is None
    assert all(jnp.array_equal(o, r) for o, r in zip(lp, [ref_pv, ref_pv * 2.0]))
    assert all(jnp.array_equal(o, r) for o, r in zip(la, [ref_art, ref_art * 2.0]))

    print("KERNEL_OK")
</pallas_src>

<mosaic_0001>
module attributes {stable_mosaic.version = 11 : i64} {
  func.func @_crop_dma_kernel(%arg0: i32, %arg1: memref<20x16x16xf32, #tpu.memory_space<any>>, %arg2: memref<20x8x8xf32, #tpu.memory_space<vmem>>, %arg3: memref<!tpu.dma_semaphore, #tpu.memory_space<semaphore_mem>>) attributes {dimension_semantics = [#tpu.dimension_semantics<parallel>], iteration_bounds = array<i64: 1>, scalar_prefetch = 0 : i64, scratch_operands = 1 : i64, tpu.core_type = #tpu.core_type<tc>, window_params = [{}, {transform_indices = @transform_1, window_bounds = array<i64: 20, 8, 8>}]} {
    %c20_i32 = arith.constant 20 : i32
    %0 = arith.muli %arg0, %c20_i32 : i32
    %c4_i32 = arith.constant 4 : i32
    %c4_i32_0 = arith.constant 4 : i32
    %1 = tpu.memref_slice %arg1[%0, %c4_i32, %c4_i32_0] : memref<20x16x16xf32, #tpu.memory_space<any>> -> memref<20x8x8xf32, #tpu.memory_space<any>>
    %c0_i32 = arith.constant 0 : i32
    %c0_i32_1 = arith.constant 0 : i32
    %c0_i32_2 = arith.constant 0 : i32
    %2 = tpu.memref_slice %arg2[%c0_i32, %c0_i32_1, %c0_i32_2] : memref<20x8x8xf32, #tpu.memory_space<vmem>> -> memref<20x8x8xf32, #tpu.memory_space<vmem>>
    tpu.enqueue_dma source(%1 : memref<20x8x8xf32, #tpu.memory_space<any>>) target(%2 : memref<20x8x8xf32, #tpu.memory_space<vmem>>) target_semaphore(%arg3 : memref<!tpu.dma_semaphore, #tpu.memory_space<semaphore_mem>>)
    %c4_i32_3 = arith.constant 4 : i32
    %c4_i32_4 = arith.constant 4 : i32
    %3 = tpu.memref_slice %arg1[%0, %c4_i32_3, %c4_i32_4] : memref<20x16x16xf32, #tpu.memory_space<any>> -> memref<20x8x8xf32, #tpu.memory_space<any>>
    %c0_i32_5 = arith.constant 0 : i32
    %c0_i32_6 = arith.constant 0 : i32
    %c0_i32_7 = arith.constant 0 : i32
    %4 = tpu.memref_slice %arg2[%c0_i32_5, %c0_i32_6, %c0_i32_7] : memref<20x8x8xf32, #tpu.memory_space<vmem>> -> memref<20x8x8xf32, #tpu.memory_space<vmem>>
    tpu.wait_dma2 semaphore(%arg3 : memref<!tpu.dma_semaphore, #tpu.memory_space<semaphore_mem>>) src(%3 : memref<20x8x8xf32, #tpu.memory_space<any>>) dst(%4 : memref<20x8x8xf32, #tpu.memory_space<vmem>>)
    return
  }
  func.func @transform_1(%arg0: i32) -> (i32, i32, i32) {
    %c0_i32 = arith.constant 0 : i32
    %c0_i32_0 = arith.constant 0 : i32
    %c0_i32_1 = arith.constant 0 : i32
    return %arg0, %c0_i32, %c0_i32_0 : i32, i32, i32
  }
}

module attributes {stable_mosaic.version = 11 : i64} {
  func.func @_crop_vmem_kernel(%arg0: i32, %arg1: memref<20x16x16xf32, #tpu.memory_space<vmem>>, %arg2: memref<20x8x8xf32, #tpu.memory_space<vmem>>) attributes {dimension_semantics = [#tpu.dimension_semantics<parallel>], iteration_bounds = array<i64: 1>, scalar_prefetch = 0 : i64, scratch_operands = 0 : i64, tpu.core_type = #tpu.core_type<tc>, window_params = [{transform_indices = @transform_0, window_bounds = array<i64: 20, 16, 16>}, {transform_indices = @transform_1, window_bounds = array<i64: 20, 8, 8>}]} {
    %c0 = arith.constant 0 : index
    %c4 = arith.constant 4 : index
    %c4_0 = arith.constant 4 : index
    %0 = vector.load %arg1[%c0, %c4, %c4_0] : memref<20x16x16xf32, #tpu.memory_space<vmem>>, vector<20x8x8xf32>
    %c0_1 = arith.constant 0 : index
    %c0_2 = arith.constant 0 : index
    %c0_3 = arith.constant 0 : index
    %1 = vector.load %arg2[%c0_1, %c0_2, %c0_3] : memref<20x8x8xf32, #tpu.memory_space<vmem>>, vector<20x8x8xf32>
    tpu.vector_store %arg2[%c0_1, %c0_2, %c0_3], %0 {strides = array<i32>} : memref<20x8x8xf32, #tpu.memory_space<vmem>>, vector<20x8x8xf32>,
    return
  }
  func.func @transform_0(%arg0: i32) -> (i32, i32, i32) {
    %c0_i32 = arith.constant 0 : i32
    %c0_i32_0 = arith.constant 0 : i32
    %c0_i32_1 = arith.constant 0 : i32
    return %arg0, %c0_i32, %c0_i32_0 : i32, i32, i32
  }
  func.func @transform_1(%arg0: i32) -> (i32, i32, i32) {
    %c0_i32 = arith.constant 0 : i32
    %c0_i32_0 = arith.constant 0 : i32
    %c0_i32_1 = arith.constant 0 : i32
    return %arg0, %c0_i32, %c0_i32_0 : i32, i32, i32
  }
}

</mosaic_0001>

<bundles_post_ra>
// kernel: tpu_custom_call.1
= control target key start
LH: loop header
LB: loop body
LE: loop exit
PB: predicated region body
PF: predicated region fallthrough
CT: control target
= control target key end

     0   :  { %s134_s10 = smov 124   ;;  %vm108_vm0 = vcmask 64512   ;;  %s305_s0 = inlined_call_operand.vmem [shape: f32[20,16,16], index: 0, kind: input, shape index: {}]   ;;  %s306_s1 = inlined_call_operand.vmem [shape: f32[20,8,8], index: 1, kind: output, shape index: {}]  }
   0x1   :  { %v10_v0 = vld [vmem:[%s305_s0 + $0x24] sm:$0xff]  ;;  %v11_v2 = vld [vmem:[%s305_s0 + $0x34] sm:$0xff] }
   0x2   :  { %v8_v1 = vld [vmem:[%s305_s0 + $0x4] sm:$0xff]  ;;  %52 = vrot.lane.b32.xlu1 %v10_v0, %s134_s10  ;;  %v9_v3 = vld [vmem:[%s305_s0 + $0x14] sm:$0xff] }
   0x3   :  { %48 = vrot.lane.b32.xlu0 %v8_v1, %s134_s10  ;;  %v13_v4 = vld [vmem:[%s305_s0 + $0x54] sm:$0xff]  ;;  %v12_v5 = vld [vmem:[%s305_s0 + $0x44] sm:$0xff] }
   0x4   :  { %v15_v6 = vld [vmem:[%s305_s0 + $0x74] sm:$0xff]  ;;  %v14_v7 = vld [vmem:[%s305_s0 + $0x64] sm:$0xff] }
   0x5   :  { %v17_v8 = vld [vmem:[%s305_s0 + $0x94] sm:$0xff]  ;;  %v16_v9 = vld [vmem:[%s305_s0 + $0x84] sm:$0xff] }
   0x6   :  { %54 = vrot.lane.b32.xlu1 %v11_v2, %s134_s10  ;;  %v19_v10 = vld [vmem:[%s305_s0 + $0xb4] sm:$0xff]  ;;  %v18_v11 = vld [vmem:[%s305_s0 + $0xa4] sm:$0xff] }
   0x7   :  { %50 = vrot.lane.b32.xlu0 %v9_v3, %s134_s10  ;;  %v21_v12 = vld [vmem:[%s305_s0 + $0xd4] sm:$0xff]  ;;  %v20_v13 = vld [vmem:[%s305_s0 + $0xc4] sm:$0xff] }
   0x8   :  { %v23_v14 = vld [vmem:[%s305_s0 + $0xf4] sm:$0xff]  ;;  %v22_v15 = vld [vmem:[%s305_s0 + $0xe4] sm:$0xff] }
   0x9   :  { %v25_v16 = vld [vmem:[%s305_s0 + $0x114] sm:$0xff]  ;;  %v24_v17 = vld [vmem:[%s305_s0 + $0x104] sm:$0xff] }
   0xa   :  { %58 = vrot.lane.b32.xlu1 %v13_v4, %s134_s10  ;;  %v27_v18 = vld [vmem:[%s305_s0 + $0x134] sm:$0xff]  ;;  %v26_v19 = vld [vmem:[%s305_s0 + $0x124] sm:$0xff] }
   0xb   :  { %56 = vrot.lane.b32.xlu0 %v12_v5, %s134_s10 }
   0xe   :  { %62 = vrot.lane.b32.xlu1 %v15_v6, %s134_s10 }
   0xf   :  { %60 = vrot.lane.b32.xlu0 %v14_v7, %s134_s10 }
  0x12   :  { %66 = vrot.lane.b32.xlu1 %v17_v8, %s134_s10 }
  0x13   :  { %64 = vrot.lane.b32.xlu0 %v16_v9, %s134_s10 }
  0x16   :  { %70 = vrot.lane.b32.xlu1 %v19_v10, %s134_s10 }
  0x17   :  { %68 = vrot.lane.b32.xlu0 %v18_v11, %s134_s10 }
  0x1a   :  { %74 = vrot.lane.b32.xlu1 %v21_v12, %s134_s10 }
  0x1b   :  { %72 = vrot.lane.b32.xlu0 %v20_v13, %s134_s10 }
  0x1e   :  { %78 = vrot.lane.b32.xlu1 %v23_v14, %s134_s10 }
  0x1f   :  { %76 = vrot.lane.b32.xlu0 %v22_v15, %s134_s10 }
  0x22   :  { %82 = vrot.lane.b32.xlu1 %v25_v16, %s134_s10 }
  0x23   :  { %80 = vrot.lane.b32.xlu0 %v24_v17, %s134_s10 }
  0x26   :  { %86 = vrot.lane.b32.xlu1 %v27_v18, %s134_s10 }
  0x27   :  { %84 = vrot.lane.b32.xlu0 %v26_v19, %s134_s10 }
  0x74   :  { %v53_v20 = vpop.permute.xlu1 %52 }
  0x75   :  { %v49_v21 = vpop.permute.xlu0 %48  ;;  %111 = vst.msk [vmem:[%s306_s1 + $0x10] sm:$0xff] %vm108_vm0, %v53_v20 }
  0x76   :  { %109 = vst.msk [vmem:[%s306_s1] sm:$0xff] %vm108_vm0, %v49_v21 }
  0x78   :  { %v55_v22 = vpop.permute.xlu1 %54 }
  0x79   :  { %v51_v23 = vpop.permute.xlu0 %50  ;;  %112 = vst.msk [vmem:[%s306_s1 + $0x18] sm:$0xff] %vm108_vm0, %v55_v22 }
  0x7a   :  { %110 = vst.msk [vmem:[%s306_s1 + $0x8] sm:$0xff] %vm108_vm0, %v51_v23 }
  0x7c   :  { %v59_v24 = vpop.permute.xlu1 %58 }
  0x7d   :  { %v57_v25 = vpop.permute.xlu0 %56  ;;  %114 = vst.msk [vmem:[%s306_s1 + $0x28] sm:$0xff] %vm108_vm0, %v59_v24 }
  0x7e   :  { %113 = vst.msk [vmem:[%s306_s1 + $0x20] sm:$0xff] %vm108_vm0, %v57_v25 }
  0x80   :  { %v63_v26 = vpop.permute.xlu1 %62 }
  0x81   :  { %v61_v27 = vpop.permute.xlu0 %60  ;;  %116 = vst.msk [vmem:[%s306_s1 + $0x38] sm:$0xff] %vm108_vm0, %v63_v26 }
  0x82   :  { %115 = vst.msk [vmem:[%s306_s1 + $0x30] sm:$0xff] %vm108_vm0, %v61_v27 }
  0x84   :  { %v67_v28 = vpop.permute.xlu1 %66 }
  0x85   :  { %v65_v29 = vpop.permute.xlu0 %64  ;;  %118 = vst.msk [vmem:[%s306_s1 + $0x48] sm:$0xff] %vm108_vm0, %v67_v28 }
  0x86   :  { %117 = vst.msk [vmem:[%s306_s1 + $0x40] sm:$0xff] %vm108_vm0, %v65_v29 }
  0x88   :  { %v71_v30 = vpop.permute.xlu1 %70 }
  0x89   :  { %v69_v31 = vpop.permute.xlu0 %68  ;;  %120 = vst.msk [vmem:[%s306_s1 + $0x58] sm:$0xff] %vm108_vm0, %v71_v30 }
  0x8a   :  { %119 = vst.msk [vmem:[%s306_s1 + $0x50] sm:$0xff] %vm108_vm0, %v69_v31 }
  0x8c   :  { %v75_v32 = vpop.permute.xlu1 %74 }
  0x8d   :  { %v73_v33 = vpop.permute.xlu0 %72  ;;  %122 = vst.msk [vmem:[%s306_s1 + $0x68] sm:$0xff] %vm108_vm0, %v75_v32 }
  0x8e   :  { %121 = vst.msk [vmem:[%s306_s1 + $0x60] sm:$0xff] %vm108_vm0, %v73_v33 }
  0x90   :  { %v79_v34 = vpop.permute.xlu1 %78 }
  0x91   :  { %v77_v35 = vpop.permute.xlu0 %76  ;;  %124 = vst.msk [vmem:[%s306_s1 + $0x78] sm:$0xff] %vm108_vm0, %v79_v34 }
  0x92   :  { %123 = vst.msk [vmem:[%s306_s1 + $0x70] sm:$0xff] %vm108_vm0, %v77_v35 }
  0x94   :  { %v83_v36 = vpop.permute.xlu1 %82 }
  0x95   :  { %v81_v37 = vpop.permute.xlu0 %80  ;;  %126 = vst.msk [vmem:[%s306_s1 + $0x88] sm:$0xff] %vm108_vm0, %v83_v36 }
  0x96   :  { %125 = vst.msk [vmem:[%s306_s1 + $0x80] sm:$0xff] %vm108_vm0, %v81_v37 }
  0x98   :  { %v87_v38 = vpop.permute.xlu1 %86 }
  0x99   :  { %v85_v39 = vpop.permute.xlu0 %84  ;;  %128 = vst.msk [vmem:[%s306_s1 + $0x98] sm:$0xff] %vm108_vm0, %v87_v38 }
  0x9a   :  { %127 = vst.msk [vmem:[%s306_s1 + $0x90] sm:$0xff] %vm108_vm0, %v85_v39 }

</bundles_post_ra>
